<compile_context>
chip_gen: v5e
topology: v5e:2x2
jax: 0.10.0
libtpu: 0.0.40
codegen_flags: <defaults>
</compile_context>

<pallas_src>
import jax
import jax.numpy as jnp
from jax.experimental import pallas as pl
from jax.experimental.pallas import tpu as pltpu


def _round_up(n, m):
    return ((n + m - 1) // m) * m


def _linear_kernel(x_ref, w_ref, b_ref, o_ref):
    # x_ref: (TILE_B, D_in)   w_ref: (D_in, D_out_pad)   b_ref: (1, D_out_pad)
    x = x_ref[...].astype(jnp.float32)
    w = w_ref[...].astype(jnp.float32)
    b = b_ref[...].astype(jnp.float32)
    acc = jnp.dot(x, w, preferred_element_type=jnp.float32) + b
    o_ref[...] = acc.astype(o_ref.dtype)


def linear_regressor_forward(x, weight, bias, *, tile_b=512):
    """y = x @ weight.T + bias  (PyTorch nn.Linear layout: weight [out, in], bias [out])."""
    B, D_in = x.shape
    D_out = weight.shape[0]

    # Lane-dense output: pad output features to a multiple of 128 lanes.
    d_out_pad = _round_up(max(D_out, 1), 128)
    w_t = jnp.pad(weight.T, ((0, 0), (0, d_out_pad - D_out)))          # (D_in, D_out_pad)
    b_p = jnp.pad(bias.reshape(1, -1), ((0, 0), (0, d_out_pad - D_out)))  # (1, D_out_pad)

    # Batch tiling: big tiles (<=512 rows), padded so the grid divides evenly.
    tile_b = min(tile_b, _round_up(B, 8))
    b_pad = _round_up(B, tile_b)
    x_p = jnp.pad(x, ((0, b_pad - B), (0, 0)))
    grid = (b_pad // tile_b,)

    out = pl.pallas_call(
        _linear_kernel,
        out_shape=jax.ShapeDtypeStruct((b_pad, d_out_pad), x.dtype),
        grid=grid,
        in_specs=[
            pl.BlockSpec((tile_b, D_in), lambda i: (i, 0)),      # streamed batch tiles
            pl.BlockSpec((D_in, d_out_pad), lambda i: (0, 0)),   # resident weight
            pl.BlockSpec((1, d_out_pad), lambda i: (0, 0)),      # resident bias
        ],
        out_specs=pl.BlockSpec((tile_b, d_out_pad), lambda i: (i, 0)),
        compiler_params=pltpu.CompilerParams(
            dimension_semantics=("parallel",),   # megacore / v7x 2-TC split
        ),
    )(x_p, w_t, b_p)

    return out[:B, :D_out]


def linear_regressor_reference(x, weight, bias):
    return (x.astype(jnp.float32) @ weight.T.astype(jnp.float32)
            + bias.astype(jnp.float32)).astype(x.dtype)


if __name__ == "__main__":
    # Small shapes consistent with LinearRegressor: batch=16, input_dim=64, output_dim=4.
    batch, input_dim, output_dim = 16, 64, 4

    key = jax.random.PRNGKey(0)
    kx, kw, kb = jax.random.split(key, 3)

    x = jax.random.normal(kx, (batch, input_dim), jnp.float32)
    # PyTorch-default-style init: U(-1/sqrt(fan_in), 1/sqrt(fan_in)), layout [out, in].
    bound = 1.0 / (input_dim ** 0.5)
    weight = jax.random.uniform(kw, (output_dim, input_dim), jnp.float32,
                                minval=-bound, maxval=bound)
    bias = jax.random.uniform(kb, (output_dim,), jnp.float32,
                              minval=-bound, maxval=bound)

    out = linear_regressor_forward(x, weight, bias)
    out = jax.block_until_ready(out)

    ref = linear_regressor_reference(x, weight, bias)
    assert out.shape == (batch, output_dim), out.shape
    assert jnp.allclose(out, ref, atol=1e-5, rtol=1e-5), "mismatch vs reference"

    print("KERNEL_OK")
</pallas_src>

<mosaic_0001>
module attributes {stable_mosaic.version = 11 : i64} {
  func.func @_linear_kernel(%arg0: i32, %arg1: memref<16x64xf32, #tpu.memory_space<vmem>>, %arg2: memref<64x128xf32, #tpu.memory_space<vmem>>, %arg3: memref<1x128xf32, #tpu.memory_space<vmem>>, %arg4: memref<16x128xf32, #tpu.memory_space<vmem>>) attributes {dimension_semantics = [#tpu.dimension_semantics<parallel>], iteration_bounds = array<i64: 1>, scalar_prefetch = 0 : i64, scratch_operands = 0 : i64, tpu.core_type = #tpu.core_type<tc>, window_params = [{transform_indices = @transform_0, window_bounds = array<i64: 16, 64>}, {pipeline_mode = #tpu.pipeline_mode<synchronous>, transform_indices = @transform_1, window_bounds = array<i64: 64, 128>}, {pipeline_mode = #tpu.pipeline_mode<synchronous>, transform_indices = @transform_2, window_bounds = array<i64: 1, 128>}, {transform_indices = @transform_3, window_bounds = array<i64: 16, 128>}]} {
    %c0 = arith.constant 0 : index
    %c0_0 = arith.constant 0 : index
    %0 = vector.load %arg1[%c0, %c0_0] : memref<16x64xf32, #tpu.memory_space<vmem>>, vector<16x64xf32>
    %c0_1 = arith.constant 0 : index
    %c0_2 = arith.constant 0 : index
    %1 = vector.load %arg2[%c0_1, %c0_2] : memref<64x128xf32, #tpu.memory_space<vmem>>, vector<64x128xf32>
    %c0_3 = arith.constant 0 : index
    %c0_4 = arith.constant 0 : index
    %2 = vector.load %arg3[%c0_3, %c0_4] : memref<1x128xf32, #tpu.memory_space<vmem>>, vector<1x128xf32>
    %cst = arith.constant dense<0.000000e+00> : vector<16x128xf32>
    %3 = tpu.matmul %0, %1, %cst {dimension_numbers = #tpu.dot_dimension_numbers<[1], [0], [0], [1], [0, 0, 1, 1], [], []>} : vector<16x64xf32>, vector<64x128xf32>, vector<16x128xf32> -> vector<16x128xf32>
    %4 = vector.broadcast %2 : vector<1x128xf32> to vector<16x128xf32>
    %5 = arith.addf %3, %4 : vector<16x128xf32>
    %c0_5 = arith.constant 0 : index
    %c0_6 = arith.constant 0 : index
    %6 = vector.load %arg4[%c0_5, %c0_6] : memref<16x128xf32, #tpu.memory_space<vmem>>, vector<16x128xf32>
    tpu.vector_store %arg4[%c0_5, %c0_6], %5 {strides = array<i32>} : memref<16x128xf32, #tpu.memory_space<vmem>>, vector<16x128xf32>,
    return
  }
  func.func @transform_0(%arg0: i32) -> (i32, i32) {
    %c0_i32 = arith.constant 0 : i32
    %c0_i32_0 = arith.constant 0 : i32
    return %arg0, %c0_i32 : i32, i32
  }
  func.func @transform_1(%arg0: i32) -> (i32, i32) {
    %c0_i32 = arith.constant 0 : i32
    %c0_i32_0 = arith.constant 0 : i32
    %c0_i32_1 = arith.constant 0 : i32
    return %c0_i32, %c0_i32_0 : i32, i32
  }
  func.func @transform_2(%arg0: i32) -> (i32, i32) {
    %c0_i32 = arith.constant 0 : i32
    %c0_i32_0 = arith.constant 0 : i32
    %c0_i32_1 = arith.constant 0 : i32
    return %c0_i32, %c0_i32_0 : i32, i32
  }
  func.func @transform_3(%arg0: i32) -> (i32, i32) {
    %c0_i32 = arith.constant 0 : i32
    %c0_i32_0 = arith.constant 0 : i32
    return %arg0, %c0_i32 : i32, i32
  }
}

</mosaic_0001>

<bundles_post_ra>
// kernel: tpu_custom_call.1
= control target key start
LH: loop header
LB: loop body
LE: loop exit
PB: predicated region body
PF: predicated region fallthrough
CT: control target
= control target key end

     0   :  { %8 = vsyncpa [#allocation3], 0  ;;  %s253_s0 = inlined_call_operand.hbm [shape: f32[16,64], index: 0, kind: input, shape index: {}]   ;;  %s254_s1 = inlined_call_operand.hbm [shape: f32[64,128], index: 1, kind: input, shape index: {}]   ;;  %s255_s2 = inlined_call_operand.vmem [shape: f32[1,128], index: 2, kind: input, shape index: {}]   ;;  %s256_s3 = inlined_call_operand.hbm [shape: f32[16,128], index: 3, kind: output, shape index: {}]  }
   0x1   :  { %9 = vsyncpa [#allocation6], 0 }
   0x2   :  { %10 = vsyncpa [#allocation4], 0  ;;  %s15_s14 = sshll.u32 %s253_s0, 4  ;;  %s207_s15 = smov [#allocation2]   ;;  %s16_s14 = int_to_ptr.hbm [resolvable:$true] %s15_s14 }
   0x3   :  { %s17_s16 = sshll.u32 %s207_s15, 4  ;;  %s28_s19 = sshll.u32 %s254_s1, 4  ;;  %s18_s16 = int_to_ptr.vmem [resolvable:$true] %s17_s16  ;;  %s29_s19 = int_to_ptr.hbm [resolvable:$true] %s28_s19 }
   0x4   :  { %s208_s20 = smov 128   ;;  %s209_s21 = smov 8  }
   0x5   :  { %23 = dma.hbm_to_vmem [thread:$0]  %s16_s14, 256, %s18_s16, [#allocation3], %s208_s20, %s208_s20, %s209_s21  }
   0x6   :  { %s210_s22 = smov [#allocation5]  }
   0x7   :  { %s30_s23 = sshll.u32 %s210_s22, 4  ;;  %s31_s23 = int_to_ptr.vmem [resolvable:$true] %s30_s23 }
   0x8   :  { %36 = dma.hbm_to_vmem [thread:$0]  %s29_s19, 1024, %s31_s23, [#allocation6], %s208_s20, %s208_s20, %s209_s21  }
   0x9   :  { %201 = dma.done.wait [#allocation3], 256  }
   0xa   :  { %202 = vsyncadd [#allocation3], 4294967040 }
   0xb   :  { %203 = dma.done.wait [#allocation6], 1024  }
   0xc   :  { %204 = vsyncadd [#allocation6], 4294966272  ;;  %v56_v0 = vld [vmem:[#allocation5 + $0x38] sm:$0xff]  ;;  %v55_v1 = vld [vmem:[#allocation5 + $0x30] sm:$0xff]  ;;  %vm61_vm0 = vcmask 523264   ;;  %s211_s24 = smov [#allocation7]  }
   0xd   :  { %76 = vmatpush.msra.mxu0 %v56_v0  ;;  %115 = vmatpush.msra.mxu1 %v56_v0  ;;  %v54_v2 = vld [vmem:[#allocation5 + $0x28] sm:$0xff]  ;;  %v53_v3 = vld [vmem:[#allocation5 + $0x20] sm:$0xff]  ;;  %v52_v4 = vld [vmem:[#allocation5 + $0x18] sm:$0xff]  ;;  %s97_s25 = sshll.u32 %s211_s24, 4  ;;  %s99_s28 = sshll.u32 %s256_s3, 4  ;;  %s98_s25 = int_to_ptr.vmem [resolvable:$true] %s97_s25  ;;  %s100_s28 = int_to_ptr.hbm [resolvable:$true] %s99_s28 }
   0xe   :  { %v51_v5 = vld [vmem:[#allocation5 + $0x10] sm:$0xff]  ;;  %v50_v6 = vld [vmem:[#allocation5 + $0x8] sm:$0xff]  ;;  %v49_v7 = vld [vmem:[#allocation5] sm:$0xff] }
   0xf   :  { %77 = vmatpush.msra.mxu0 %v55_v1  ;;  %116 = vmatpush.msra.mxu1 %v55_v1  ;;  %v47_v8 = vld [vmem:[#allocation2] sm:$0xff]  ;;  %v48_v9 = vld [vmem:[#allocation2 + $0x8] sm:$0xff] }
  0x10   :  { %v128_v10 = vld [vmem:[%s255_s2] ss:$0 sm:$0xff] }
  0x11   :  { %78 = vmatpush.msra.mxu0 %v54_v2  ;;  %117 = vmatpush.msra.mxu1 %v54_v2 }
  0x13   :  { %79 = vmatpush.msra.mxu0 %v53_v3  ;;  %118 = vmatpush.msra.mxu1 %v53_v3 }
  0x15   :  { %80 = vmatpush.msra.mxu0 %v52_v4  ;;  %119 = vmatpush.msra.mxu1 %v52_v4 }
  0x17   :  { %81 = vmatpush.msra.mxu0 %v51_v5  ;;  %120 = vmatpush.msra.mxu1 %v51_v5 }
  0x19   :  { %82 = vmatpush.msra.mxu0 %v50_v6  ;;  %121 = vmatpush.msra.mxu1 %v50_v6 }
  0x1b   :  { %83 = vmatpush.msra.mxu0 %v49_v7  ;;  %122 = vmatpush.msra.mxu1 %v49_v7 }
  0x1c   :  { %113 = vmatmul.msk.f32.vlgmr.msra.gmra.mxu0 %vm61_vm0, %v47_v8  ;;  %114 = vmatmul.msk.f32.vlgmr.msra.gmra.mxu1 %vm61_vm0, %v48_v9 }
  0x99   :  { %v85_v11 = vpop.f32.mrf.mxu0  ;;  %v88_v12 = vpop.f32.mrf.mxu1 }
  0x9a   :  { %v86_v13 = vadd.f32 %v128_v10, %v85_v11  ;;  %v89_v14 = vadd.f32 %v128_v10, %v88_v12 }
  0x9c   :  { %91 = vst [vmem:[#allocation7] sm:$0xff] %v86_v13 }
  0x9d   :  { %92 = vst [vmem:[#allocation7 + $0x8] sm:$0xff] %v89_v14 }
  0x9e   :  { %105 = dma.vmem_to_hbm [thread:$0]  %s98_s25, 256, %s100_s28, [#allocation4], %s208_s20, %s208_s20, %s209_s21  }
  0x9f   :  { %205 = dma.done.wait [#allocation4], 256  }
  0xa0   :  { %206 = vsyncadd [#allocation4], 4294967040 }
  0xa1   :  { %110 = vsyncpa [#allocation3], 1 }
  0xa2   :  { %111 = vsyncpa [#allocation6], 1 }
  0xa3   :  { %112 = vsyncpa [#allocation4], 1 }

</bundles_post_ra>
